<compile_context>
chip_gen: v5e
topology: v5e:2x2
jax: 0.10.0
libtpu: 0.0.40
codegen_flags: <defaults>
</compile_context>

<pallas_src>
import jax
import jax.numpy as jnp
from jax.experimental import pallas as pl
from jax.experimental.pallas import tpu as pltpu


_TARGET_TILE_BYTES = 2 * 1024 * 1024     # per-buffer tile cap (v5e/v6e/v7x safe)
_VMEM_LIMIT_BYTES = 32 * 1024 * 1024     # explicit scoped-VMEM limit


def _se_kernel_spatial_lane(x_ref, o_ref):
    # Block: (1, TC, H*W) — spatial flattened onto lanes, reduce over lanes.
    x = x_ref[...]
    xf = x.astype(jnp.float32)
    inv_hw = 1.0 / x.shape[-1]
    y = jnp.sum(xf, axis=-1, keepdims=True) * inv_hw       # (1, TC, 1)
    o_ref[...] = (xf * y).astype(o_ref.dtype)


def _se_kernel_channel_lane(x_ref, o_ref):
    # Block: (1, H*W, TC) — channels on lanes (lane-dense stores), reduce over
    # the sublane (spatial) axis.
    x = x_ref[...]
    xf = x.astype(jnp.float32)
    inv_hw = 1.0 / x.shape[-2]
    y = jnp.sum(xf, axis=-2, keepdims=True) * inv_hw        # (1, 1, TC)
    o_ref[...] = (xf * y).astype(o_ref.dtype)


def _round_down(v, m):
    return max(m, (v // m) * m)


def se_layer(x):
    """SELayer forward (exact PyTorch semantics): x * mean(x over H,W).

    x: (B, C, H, W), float32 or bfloat16.  Returns same shape/dtype.
    """
    B, C, H, W = x.shape
    HW = H * W
    itemsize = x.dtype.itemsize

    cost = pl.CostEstimate(
        flops=2 * B * C * HW,
        transcendentals=0,
        bytes_accessed=2 * B * C * HW * itemsize,
    )
    cparams = pltpu.CompilerParams(
        dimension_semantics=("parallel", "parallel"),
        vmem_limit_bytes=_VMEM_LIMIT_BYTES,
    )

    if HW >= 128:
        # --- Layout A: spatial on lanes, channel tile on sublanes ------------
        granule = 8 * max(1, 4 // itemsize)          # 8 for f32, 16 for bf16
        tc = max(1, _TARGET_TILE_BYTES // (HW * itemsize))
        if tc >= C:
            tc = C                                    # full channel dim always legal
        else:
            tc = _round_down(tc, granule)             # (8,128) sublane constraint
        grid = (B, pl.cdiv(C, tc))

        x_in = x.reshape(B, C, HW)
        out = pl.pallas_call(
            _se_kernel_spatial_lane,
            out_shape=jax.ShapeDtypeStruct((B, C, HW), x.dtype),
            grid_spec=pltpu.PrefetchScalarGridSpec(
                num_scalar_prefetch=0,
                grid=grid,
                in_specs=[pl.BlockSpec((1, tc, HW), lambda b, c: (b, c, 0))],
                out_specs=pl.BlockSpec((1, tc, HW), lambda b, c: (b, c, 0)),
            ),
            compiler_params=cparams,
            cost_estimate=cost,
            input_output_aliases={0: 0},
        )(x_in)
        return out.reshape(B, C, H, W)

    # --- Layout B: small spatial -> channels on lanes (lane-dense output) ----
    tc = max(1, _TARGET_TILE_BYTES // (HW * itemsize))
    if tc >= C or C <= 128:
        tc = C                                        # full channel dim always legal
    else:
        tc = _round_down(tc, 128)                     # lane-dim constraint
    grid = (B, pl.cdiv(C, tc))

    x_in = jnp.transpose(x.reshape(B, C, HW), (0, 2, 1))     # (B, HW, C)
    out = pl.pallas_call(
        _se_kernel_channel_lane,
        out_shape=jax.ShapeDtypeStruct((B, HW, C), x.dtype),
        grid_spec=pltpu.PrefetchScalarGridSpec(
            num_scalar_prefetch=0,
            grid=grid,
            in_specs=[pl.BlockSpec((1, HW, tc), lambda b, c: (b, 0, c))],
            out_specs=pl.BlockSpec((1, HW, tc), lambda b, c: (b, 0, c)),
        ),
        compiler_params=cparams,
        cost_estimate=cost,
        input_output_aliases={0: 0},
    )(x_in)
    return jnp.transpose(out, (0, 2, 1)).reshape(B, C, H, W)


def init_se_params(channel, reduction=16, key=jax.random.PRNGKey(42)):
    """Deterministic init of the (dead-code) 1x1-conv squeeze/excite params.

    Unused: the PyTorch forward never takes the fc branches (module-vs-bool
    comparison is always False); kept only to document the original module.
    """
    cr = max(channel // reduction, 1)
    k1, k2 = jax.random.split(key)
    return {
        "w1": jax.random.normal(k1, (cr, channel, 1, 1), jnp.float32) * 0.05,
        "b1": jnp.zeros((cr,), jnp.float32),
        "w2": jax.random.normal(k2, (channel, cr, 1, 1), jnp.float32) * 0.05,
        "b2": jnp.zeros((channel,), jnp.float32),
    }


if __name__ == "__main__":
    key = jax.random.PRNGKey(0)
    k1, k2 = jax.random.split(key)

    _ = init_se_params(4, reduction=16)   # deterministic, unused (dead code)

    # Case 1: H*W >= 128 -> spatial-on-lanes layout.
    x1 = jax.random.normal(k1, (2, 4, 16, 16), jnp.float32)
    out1 = jax.block_until_ready(se_layer(x1))
    ref1 = x1 * jnp.mean(x1, axis=(2, 3), keepdims=True)
    assert jnp.allclose(out1, ref1, atol=1e-5, rtol=1e-5), "mismatch (layout A)"

    # Case 2: small spatial -> channels-on-lanes (lane-dense output) layout.
    x2 = jax.random.normal(k2, (2, 256, 4, 4), jnp.float32)
    out2 = jax.block_until_ready(se_layer(x2))
    ref2 = x2 * jnp.mean(x2, axis=(2, 3), keepdims=True)
    assert jnp.allclose(out2, ref2, atol=1e-5, rtol=1e-5), "mismatch (layout B)"

    print("KERNEL_OK")
</pallas_src>

<mosaic_0001>
module attributes {stable_mosaic.version = 11 : i64} {
  func.func @_se_kernel_spatial_lane(%arg0: i32, %arg1: i32, %arg2: memref<1x4x256xf32, #tpu.memory_space<vmem>>, %arg3: memref<1x4x256xf32, #tpu.memory_space<vmem>>) attributes {dimension_semantics = [#tpu.dimension_semantics<parallel>, #tpu.dimension_semantics<parallel>], iteration_bounds = array<i64: 2, 1>, scalar_prefetch = 0 : i64, scratch_operands = 0 : i64, tpu.core_type = #tpu.core_type<tc>, window_params = [{transform_indices = @transform_0, window_bounds = array<i64: 1, 4, 256>}, {transform_indices = @transform_1, window_bounds = array<i64: 1, 4, 256>}]} {
    %c0 = arith.constant 0 : index
    %c0_0 = arith.constant 0 : index
    %c0_1 = arith.constant 0 : index
    %0 = vector.load %arg2[%c0, %c0_0, %c0_1] : memref<1x4x256xf32, #tpu.memory_space<vmem>>, vector<1x4x256xf32>
    %cst = arith.constant dense<0.000000e+00> : vector<1x4xf32>
    %1 = vector.multi_reduction <add>, %0, %cst [2] : vector<1x4x256xf32> to vector<1x4xf32>
    %2 = vector.shape_cast %1 : vector<1x4xf32> to vector<1x4x1xf32>
    %cst_2 = arith.constant 3.906250e-03 : f32
    %3 = vector.broadcast %cst_2 : f32 to vector<1x4x1xf32>
    %4 = arith.mulf %2, %3 : vector<1x4x1xf32>
    %5 = vector.broadcast %4 : vector<1x4x1xf32> to vector<1x4x256xf32>
    %6 = arith.mulf %0, %5 : vector<1x4x256xf32>
    %c0_3 = arith.constant 0 : index
    %c0_4 = arith.constant 0 : index
    %c0_5 = arith.constant 0 : index
    %7 = vector.load %arg3[%c0_3, %c0_4, %c0_5] : memref<1x4x256xf32, #tpu.memory_space<vmem>>, vector<1x4x256xf32>
    tpu.vector_store %arg3[%c0_3, %c0_4, %c0_5], %6 {strides = array<i32>} : memref<1x4x256xf32, #tpu.memory_space<vmem>>, vector<1x4x256xf32>,
    return
  }
  func.func @transform_0(%arg0: i32, %arg1: i32) -> (i32, i32, i32) {
    %c0_i32 = arith.constant 0 : i32
    %c0_i32_0 = arith.constant 0 : i32
    return %arg0, %arg1, %c0_i32 : i32, i32, i32
  }
  func.func @transform_1(%arg0: i32, %arg1: i32) -> (i32, i32, i32) {
    %c0_i32 = arith.constant 0 : i32
    %c0_i32_0 = arith.constant 0 : i32
    return %arg0, %arg1, %c0_i32 : i32, i32, i32
  }
}

</mosaic_0001>

<bundles_post_ra>
// kernel: tpu_custom_call.1
= control target key start
LH: loop header
LB: loop body
LE: loop exit
PB: predicated region body
PF: predicated region fallthrough
CT: control target
= control target key end

     0   :  { %6 = vsyncpa [#allocation3], 0  ;;  %s603_s0 = inlined_call_operand.hbm [shape: f32[2,4,256], index: 0, kind: input, shape index: {}, may-alias: {0,1}]   ;;  %s604_s1 = inlined_call_operand.hbm [shape: f32[2,4,256], index: 1, kind: output, shape index: {}, may-alias: {0,1}]  }
   0x1   :  { %8 = vsyncpa [#allocation3 + $0x1], 0 }
   0x2   :  { %9 = vsyncpa [#allocation4], 0 }
   0x3   :  { %11 = vsyncpa [#allocation4 + $0x1], 0  ;;  %s483_s6 = smov 0   ;;  %s485_s7 = smov 0  }
   0x4   :  { %s487_s8 = smov 0   ;;  %s489_s9 = smov 0  }
   0x5   :  { %s491_s10 = smov 0   ;;  %s493_s11 = smov 0  }
   0x6 LB: > { %s278_s12 = sadd.s32 4294967295, %s470_s11   ;;  %s279_s13 = sadd.s32 4294967294, %s470_s11   ;;  %s470_s11 = sphi %s493_s11, %s17_s11   ;;  %s466_s10 = sphi %s491_s10, %s613_s10   ;;  %s462_s9 = sphi %s489_s9, %s612_s9   ;;  %s458_s8 = sphi %s487_s8, %s611_s8   ;;  %s454_s7 = sphi %s485_s7, %s610_s7   ;;  %s450_s6 = sphi %s483_s6, %s609_s6  }
   0x7   : > { %s29_s14 = sadd.s32 1, %s466_s10  ;;  %s38_s15 = sadd.s32 1, %s458_s8 }
   0x8   : > { %p31_p0 = scmp.ge.s32.totalorder %s29_s14, 2  ;;  %p45_p1 = scmp.ne.s32.totalorder %s458_s8, %s454_s7 }
   0x9   : > { %p46_p2 = scmp.eq.s32.totalorder %s470_s11, 0  ;;  %p51_p3 = scmp.ne.s32.totalorder %s454_s7, %s450_s6 }
   0xa   : > { %s615_s14 = smov (%p31_p0, %s29_s14), 0  ;;  %p52_p5 = scmp.eq.s32.totalorder %s278_s12, 0 }
   0xb   : > { %p524_p4 = por %p46_p2, %p45_p1  ;;  %s33_s17 = ssub.s32 %s466_s10, %s615_s14 }
   0xc   : > { %p77_p6 = scmp.eq.s32.totalorder %s278_s12, 1  ;;  %p36_p7 = scmp.eq.s32.totalorder %s33_s17, 0 }
   0xd   : > { %p530_p8 = por %p52_p5, %p51_p3  ;;  %p83_p10 = scmp.eq.s32.totalorder %s279_s13, 1 }
   0xe   : > { %p534_p9 = por %p77_p6, %p45_p1  ;;  %p281_p12 = scmp.ge.s32.totalorder %s470_s11, 2 }
   0xf   : > { %s539_s20 = scalar_select %p36_p7, %s458_s8, %s38_s15  }
  0x10   : > { %p541_p11 = por %p83_p10, %p51_p3  ;;  %p307_p13 = scmp.lt.s32.totalorder %s470_s11, 2 }
  0x11   : > { %s103_s22 = sand.u32 1, %s458_s8   ;;  %s293_s24 = sshll.u32 %s466_s10, 3 }
  0x12   : > { %s282_s23 = sshll.u32 %s103_s22, 3  ;;  %s114_s27 = scalar_lea.hbm %s603_s0, %s293_s24 }
  0x13   : > { %s107_s28 = scalar_lea.vmem [#allocation2], %s282_s23  ;;  %s116_s30 = sshll.u32 %s114_s27, 4  ;;  %s117_s30 = int_to_ptr.hbm [resolvable:$true] %s116_s30 }
  0x14   : > { %s118_s29 = sshll.u32 %s107_s28, 4  ;;  %p300_p0 = pnand %p307_p13, %p524_p4  ;;  %s119_s29 = int_to_ptr.vmem [resolvable:$true] %s118_s29 }
  0x15   : > { %p285_p1 = scmp.ge.s32.totalorder %s470_s11, 1  ;;  %p123_p2 = scmp.lt.s32.totalorder %s470_s11, 3 }
  0x16   : > { %s104_s2 = scalar_lea.sflag [#allocation3], %s103_s22 }
  0x17   : > { %302 = dma.hbm_to_vmem [thread:$0]  (!%p300_p0), %s117_s30, 128, %s119_s29, %s104_s2  }
  0x18   : > { %p124_p3 = pnand %p285_p1, %p123_p2 }
  0x19   : > { %s557_s3 = sand.u32 (!%p124_p3), 1, %s454_s7  }
  0x1a   : > { %127 = sbr.rel (%p124_p3) target bundleno = 169 (0xa9), region = 24  ;;  %s286_s4 = sshll.u32 (!%p124_p3), %s557_s3, 3 }
  0x1b   : > { %s130_s5 = scalar_lea.sflag (!%p124_p3), [#allocation3], %s557_s3  ;;  %s133_s12 = scalar_lea.vmem (!%p124_p3), [#allocation2], %s286_s4 }
  0x1f   : > { %441 = dma.done.wait (%p530_p8), %s130_s5, 128  }
  0x20   : > { %443 = vsyncadd (%p530_p8), %s130_s5, 4294967168  ;;  %v153_v0 = vld [vmem:[%s133_s12] sm:$0xff]  ;;  %vm160_vm0 = vcmask 1043456   ;;  %v472_v6 = vmov 839922192   ;;  %s294_s13 = sshll.u32 %s462_s9, 3 }
  0x21   : > { %155 = vst [vmem:[#allocation1] ss:$2 sm:$0xff] %v153_v0  ;;  %v169_v7 = vunpack.c.l.s4 %v472_v6  ;;  %s189_s17 = scalar_lea.hbm %s604_s1, %s294_s13  ;;  %s152_s18 = scalar_lea.vmem [#allocation5], %s286_s4 }
  0x22   : > { %s191_s22 = sshll.u32 %s152_s18, 4  ;;  %s193_s23 = sshll.u32 %s189_s17, 4  ;;  %s192_s22 = int_to_ptr.vmem [resolvable:$true] %s191_s22  ;;  %s194_s23 = int_to_ptr.hbm [resolvable:$true] %s193_s23 }
  0x23   : > { %v170_v8 = vunpack.c.0.s8 %v169_v7  ;;  %s176_s24 = scalar_lea.sflag [#allocation4], %s557_s3  ;;  %s402_s25 = sshra.s32 %s194_s23, 4  ;;  %s403_s25 = int_to_ptr.hbm [resolvable:$true] %s402_s25 }
  0x24   : > { %s404_s9 = scalar_lea.hbm %s403_s25, 8  ;;  %s408_s28 = scalar_lea.hbm %s604_s1, 16 }
  0x25   : > { %p405_p4 = scmp.ne.s32.totalorder %s403_s25, %s404_s9  ;;  %p409_p7 = scmp.lt.s32.totalorder %s403_s25, %s604_s1 }
  0x26   : > { %p410_p8 = scmp.lt.s32.totalorder %s408_s28, %s404_s9 }
  0x27   : > { %p406_p5 = pnand %p405_p4, %p534_p9 }
  0x28   : > { %v156_v1 = vld.sshfl [vmem:[#allocation1] sm:$0xff pattern:$0x75316420]  ;;  %v157_v2 = vld.sshfl [vmem:[#allocation1 + $0x8] sm:$0xff pattern:$0x75316420]  ;;  %p411_p10 = por %p410_p8, %p409_p7 }
  0x29   : > { %v161_v3 = vsel %vm160_vm0, %v156_v1, 0.0  ;;  %v162_v4 = vsel %vm160_vm0, %v157_v2, 0.0  ;;  %p407_p6 = pneg %p406_p5 }
  0x2a   : > { %v163_v5 = vadd.f32 %v162_v4, %v161_v3 }
  0x2b   : > { %p412_p13 = pnand %p411_p10, %p407_p6 }
  0x2c   : > { %164 = vadd.xlane.f32.xlu0 %v163_v5 }
  0x9f   : > { %v165_v9 = vpop.xlane.xlu0 %164 }
  0xa0   : > { %v166_v10 = vmul.f32 0.00390625, %v165_v9 }
  0xa2   : > { %v171_v11 = vperm.slane %v166_v10, %v170_v8 }
  0xa4   : > { %v173_v12 = vmul.f32 %v171_v11, %v153_v0 }
  0xa6   : > { %174 = vst [vmem:[%s152_s18] sm:$0xff] %v173_v12 }
  0xa7   : > { %415 = shalt.err (!%p412_p13)
}
  0xa8   : > { %297 = dma.vmem_to_hbm [thread:$0]  (%p534_p9), %s192_s22, 128, %s194_s23, %s176_s24  }
  0xa9 PF: > { %s205_s2 = sand.u32 1, %s450_s6   ;;  %p304_p0 = pnand %p281_p12, %p541_p11 }
  0xaa   : > { %s206_s3 = scalar_lea.sflag [#allocation4], %s205_s2 }
  0xab   : > { %p305_p1 = pneg %p304_p0 }
  0xad   : > { %445 = dma.done.wait (%p305_p1), %s206_s3, 128  }
  0xae   : > { %447 = vsyncadd (%p305_p1), %s206_s3, 4294967168  ;;  %s17_s11 = sadd.s32 1, %s470_s11   ;;  %s609_s6 = smov %s454_s7 }
  0xaf   : > { %p14_p2 = scmp.ge.s32.totalorder %s17_s11, 4   ;;  %s610_s7 = smov %s458_s8 }
  0xb0   : > { %s611_s8 = smov %s539_s20  ;;  %s612_s9 = smov %s466_s10 }
  0xb1   : > { %s613_s10 = smov %s615_s14  ;;  %16 = sbr.rel (!%p14_p2) target bundleno = 6 (0x6), region = 69 }
  0xb6   :  { %212 = vsyncpa [#allocation3], 1 }
  0xb7   :  { %214 = vsyncpa [#allocation3 + $0x1], 1 }
  0xb8   :  { %215 = vsyncpa [#allocation4], 1 }
  0xb9   :  { %217 = vsyncpa [#allocation4 + $0x1], 1 }

</bundles_post_ra>
